<compile_context>
chip_gen: v6e
topology: v6e:2x2x1
jax: 0.10.0
libtpu: 0.0.40
codegen_flags: <defaults>
</compile_context>

<pallas_src>
import functools
import math

import jax
import jax.numpy as jnp
from jax.experimental import pallas as pl
from jax.experimental.pallas import tpu as pltpu

_VMEM_LIMIT = 32 * 1024 * 1024   # conservative; fits v5e/v6e/v7x scoped VMEM


def _pad128(d):
    return ((d + 127) // 128) * 128


def _row_tile(M):
    """Whole-M single block for small problems (no padding, no partial blocks);
    256-row parallel tiles otherwise (shards across the two TCs on v7x)."""
    if M <= 256:
        return M, 1
    return 256, pl.cdiv(M, 256)


# ----------------------------------------------------------------------------
# Pallas kernel 1: fused ResMLP  (all hidden layers + residual skips + 2 heads)
# ----------------------------------------------------------------------------
def _resmlp_fused_kernel(x_ref, *refs, n_hidden, residual, head2_act):
    o1_ref, o2_ref = refs[-2], refs[-1]
    wb = refs[:-2]                       # [w0,b0, ..., w_{h-1},b_{h-1}, wh1,bh1, wh2,bh2]

    h = x_ref[...]                                           # (tm, in_feat) f32
    for li in range(n_hidden):
        w = wb[2 * li][...]
        b = wb[2 * li + 1][...]
        y = jnp.dot(h.astype(jnp.bfloat16), w.astype(jnp.bfloat16),
                    preferred_element_type=jnp.float32) + b
        y = jnp.tanh(y)
        h = (y + h) if residual[li] else y                   # residual flags use UNPADDED dims

    hb = h.astype(jnp.bfloat16)
    w1 = wb[2 * n_hidden][...]
    b1 = wb[2 * n_hidden + 1][...]
    w2 = wb[2 * n_hidden + 2][...]
    b2 = wb[2 * n_hidden + 3][...]
    out1 = jnp.dot(hb, w1.astype(jnp.bfloat16), preferred_element_type=jnp.float32) + b1
    out2 = jnp.dot(hb, w2.astype(jnp.bfloat16), preferred_element_type=jnp.float32) + b2
    if head2_act == "neg_half_softplus":                     # natparam eta2 head
        out2 = -0.5 * jax.nn.softplus(out2)
    elif head2_act == "softplus":                            # standard var head
        out2 = jax.nn.softplus(out2)
    o1_ref[...] = out1.astype(o1_ref.dtype)
    o2_ref[...] = out2.astype(o2_ref.dtype)


# ----------------------------------------------------------------------------
# Pallas kernel 2: Gaussian natural-parameter linear + quadratic form
#    out[n, k] = x[n] . eta1[n, k]  +  x[n]^T eta2[n, k] x[n]
# The quadratic form is fed as <vec(eta2), vec(x x^T)> so the kernel only does
# lane-axis reductions; the (N, K) output keeps K on the lane axis.
# ----------------------------------------------------------------------------
def _nat_quad_kernel(x_ref, xx_ref, e1_ref, e2_ref, o_ref):
    x = x_ref[...]                                    # (tn, D)
    xx = xx_ref[...]                                  # (tn, D*D)
    e1 = e1_ref[...]                                  # (tn, K, D)
    e2 = e2_ref[...]                                  # (tn, K, D*D)
    lin = jnp.sum(e1 * x[:, None, :], axis=-1)        # (tn, K)
    quad = jnp.sum(e2 * xx[:, None, :], axis=-1)      # (tn, K)
    o_ref[...] = (lin + quad).astype(o_ref.dtype)


def pallas_nat_quad_nk(x, eta1, eta2):
    """x: (N, D); eta1: (N, K, D); eta2: (N, K, D, D) -> (N, K)."""
    N, K, D = eta1.shape
    # Tiny XLA-side prep: vec(x x^T) and a metadata-only reshape of eta2.
    # x is fed ONCE (no K-fold jnp.repeat, no jnp.pad of eta2).
    xx = (x[:, :, None] * x[:, None, :]).reshape(N, D * D)
    e2f = eta2.reshape(N, K, D * D)
    tn, grid_n = _row_tile(N)
    return pl.pallas_call(
        _nat_quad_kernel,
        out_shape=jax.ShapeDtypeStruct((N, K), jnp.float32),
        grid=(grid_n,),
        in_specs=[
            pl.BlockSpec((tn, D), lambda i: (i, 0)),
            pl.BlockSpec((tn, D * D), lambda i: (i, 0)),
            pl.BlockSpec((tn, K, D), lambda i: (i, 0, 0)),
            pl.BlockSpec((tn, K, D * D), lambda i: (i, 0, 0)),
        ],
        out_specs=pl.BlockSpec((tn, K), lambda i: (i, 0)),
        compiler_params=pltpu.CompilerParams(
            dimension_semantics=("parallel",),
            vmem_limit_bytes=_VMEM_LIMIT),
    )(x, xx, eta1, e2f)


# ----------------------------------------------------------------------------
# gaussian.* helpers (standard SVAE natural-parameter Gaussian utilities;
# the `gaussian` module is not part of the provided snippet).
# ----------------------------------------------------------------------------
def gaussian_natural_to_standard(eta1, eta2):
    sigma = jnp.linalg.inv(-2.0 * eta2)
    mu = jnp.matmul(sigma, eta1[..., None])[..., 0]
    return mu, sigma


def gaussian_log_prob_nat(x, eta1, eta2, weights=None):
    """x: (N, D); eta1: (N, K, D); eta2: (N, K, D, D); weights: (K,)."""
    N, K, D = eta1.shape
    linquad = pallas_nat_quad_nk(x, eta1, eta2)                       # (N, K)
    logprob = linquad - 0.5 * D * jnp.log(2.0 * jnp.pi)
    solved = jnp.linalg.solve(eta2, eta1[..., None])                  # (N,K,D,1)
    logprob = logprob + 0.25 * jnp.sum(solved * eta1[..., None], axis=(-2, -1))
    _sign, logabsdet = jnp.linalg.slogdet(-2.0 * eta2)                # -2*eta2 is PD
    logprob = logprob - 0.5 * logabsdet
    if weights is not None:
        logprob = logprob + jnp.log(weights)[None, :]
    return logprob - jax.scipy.special.logsumexp(logprob, axis=1, keepdims=True)


# ----------------------------------------------------------------------------
# SVAE pieces (translated from the PyTorch module)
# ----------------------------------------------------------------------------
def unpack_recognition_gmm(phi_gmm):
    eta1, L_k_raw, pi_k_raw = phi_gmm
    K, D, _ = L_k_raw.shape
    L_k = jnp.tril(L_k_raw)
    mask = jnp.eye(D, dtype=jnp.float32)[None, :, :]
    diag_sp = jax.nn.softplus(jnp.diagonal(L_k, axis1=-2, axis2=-1))   # (K, D)
    L_k = diag_sp[:, :, None] * mask + L_k * (1.0 - mask)
    P = jnp.matmul(L_k, jnp.swapaxes(L_k, -2, -1))
    eta2 = -0.5 * P
    pi_k = jax.nn.softmax(pi_k_raw, axis=0)
    return eta1, eta2, pi_k


def compute_log_z_given_y(eta1_phi1, eta2_phi1, eta1_phi2, eta2_phi2, pi_phi2):
    N, D = eta1_phi1.shape
    K = eta1_phi2.shape[0]
    eta2_phi_tilde = eta2_phi1[:, None] + eta2_phi2[None]              # (N,K,D,D)
    solved = jnp.linalg.solve(
        jnp.broadcast_to(eta2_phi2[None], (N, K, D, D)), eta2_phi_tilde)
    w_eta2 = jnp.einsum('nij,nkjl->nkil', eta2_phi1, solved)
    w_eta2 = 0.5 * (w_eta2 + jnp.swapaxes(w_eta2, -1, -2))
    solved2 = jnp.linalg.solve(
        eta2_phi_tilde,
        jnp.broadcast_to(eta1_phi2[None, :, :, None], (N, K, D, 1)))
    # Reproduces the original PyTorch einsum string literally ('nij,nkuv->nkj').
    w_eta1 = jnp.einsum('nij,nkuv->nkj', eta2_phi1, solved2)
    mu_phi1, _ = gaussian_natural_to_standard(eta1_phi1, eta2_phi1)
    return gaussian_log_prob_nat(mu_phi1, w_eta1, w_eta2, pi_phi2), (w_eta1, w_eta2)


def sample_x_per_comp(eta1, eta2, num_samples, key):
    inv_sigma = -2.0 * eta2
    N, K, _, D = eta2.shape
    L = jnp.linalg.cholesky(inv_sigma)
    eps = jax.random.normal(key, (N, K, D, num_samples), dtype=jnp.float32)
    eps = jnp.linalg.solve(jnp.swapaxes(L, -1, -2), eps)
    x_samples = jnp.swapaxes(jnp.linalg.solve(inv_sigma, eta1) + eps, -1, -2)
    return x_samples                                                   # (N,K,S,D)


def subsample_x(X_samples, log_q_z_given_y, key):
    N, K, S, D = X_samples.shape
    logits = jnp.broadcast_to(log_q_z_given_y[:, None, :], (N, S, K))
    # torch.multinomial(softmax(log_q), S, replacement=True) -> categorical draw
    z_samples = jax.random.categorical(key, logits, axis=-1)           # (N, S)
    n_idx = jnp.arange(N)[:, None]
    s_idx = jnp.arange(S)[None, :]
    return X_samples[n_idx, z_samples, s_idx]                          # (N, S, D)


# ----------------------------------------------------------------------------
# ResMLP (encoder / decoder) — params are padded to 128-lane slabs ONCE at init
# ----------------------------------------------------------------------------
def _init_linear(key, fan_in, fan_out, pad_in, pad_out):
    wk, bk = jax.random.split(key)
    scale = 1.0 / math.sqrt(fan_in)
    w = jax.random.uniform(wk, (fan_in, fan_out), jnp.float32, -scale, scale)
    b = jax.random.uniform(bk, (fan_out,), jnp.float32, -scale, scale)
    wp = jnp.zeros((pad_in, pad_out), jnp.float32).at[:fan_in, :fan_out].set(w)
    bp = jnp.zeros((1, pad_out), jnp.float32).at[0, :fan_out].set(b)
    return wp, bp


def init_resmlp(key, in_dim, hidden_dims, out_dim):
    hidden_dims = tuple(hidden_dims)
    n_hidden = len(hidden_dims)
    dims = [in_dim] + list(hidden_dims)
    hid_pad = [_pad128(d) for d in hidden_dims]
    out_pad = _pad128(out_dim)
    # Keep the input feature dim unpadded (it is only the sublane axis of W0)
    # unless the first residual skip needs matching padded widths.
    in_feat = _pad128(in_dim) if (n_hidden and in_dim == hidden_dims[0]) else in_dim
    in_pads = [in_feat] + hid_pad
    keys = jax.random.split(key, n_hidden + 2)
    hidden = [_init_linear(keys[i], dims[i], dims[i + 1], in_pads[i], in_pads[i + 1])
              for i in range(n_hidden)]
    return {
        "hidden": hidden,
        "head1": _init_linear(keys[-2], dims[-1], out_dim, in_pads[-1], out_pad),
        "head2": _init_linear(keys[-1], dims[-1], out_dim, in_pads[-1], out_pad),
        "in_dim": in_dim,
        "in_feat": in_feat,
        "hidden_dims": hidden_dims,
        "out_dim": out_dim,
        "out_pad": out_pad,
        "residual": tuple(dims[i] == dims[i + 1] for i in range(n_hidden)),
    }


def resmlp_apply(params, x, output_type):
    # TODO(synk): ResMLP source is not in the provided snippet; implemented as a
    # tanh MLP with residual skips between equal-width hidden layers and two
    # output heads: (eta1, eta2=-0.5*softplus) for 'natparam',
    # (mean, var=softplus) for 'standard'.
    M = x.shape[0]
    n_hidden = len(params["hidden_dims"])
    in_feat = params["in_feat"]
    if x.shape[1] != in_feat:
        x = jnp.pad(x, ((0, 0), (0, in_feat - x.shape[1])))
    head2_act = "neg_half_softplus" if output_type == "natparam" else "softplus"
    tm, grid_m = _row_tile(M)
    out_pad = params["out_pad"]

    weight_args = []
    in_specs = [pl.BlockSpec((tm, in_feat), lambda i: (i, 0))]
    for (w, b) in list(params["hidden"]) + [params["head1"], params["head2"]]:
        weight_args += [w, b]
        in_specs += [pl.BlockSpec(w.shape, lambda i: (0, 0)),      # VMEM-resident
                     pl.BlockSpec(b.shape, lambda i: (0, 0))]
    out_specs = [pl.BlockSpec((tm, out_pad), lambda i: (i, 0))] * 2
    out_shape = [jax.ShapeDtypeStruct((M, out_pad), jnp.float32)] * 2

    out1, out2 = pl.pallas_call(
        functools.partial(_resmlp_fused_kernel, n_hidden=n_hidden,
                          residual=params["residual"], head2_act=head2_act),
        grid=(grid_m,),
        in_specs=in_specs,
        out_specs=out_specs,
        out_shape=out_shape,
        compiler_params=pltpu.CompilerParams(
            dimension_semantics=("parallel",),
            vmem_limit_bytes=_VMEM_LIMIT),
    )(x, *weight_args)
    d = params["out_dim"]
    return out1[:, :d], out2[:, :d]


# ----------------------------------------------------------------------------
# SVAE e_step + forward  (pgm_type='gmm', enc='natparam', dec='standard',
#                         full_dependency=False)
# ----------------------------------------------------------------------------
def e_step(phi_enc, phi_gmm, num_latent_sample, key):
    eta1_phi1, eta2_phi1 = phi_enc
    D = eta2_phi1.shape[-1]
    # full_dependency=False: expand diagonal encoder eta2 to a (N, D, D) matrix
    eta2_phi1 = jnp.eye(D, dtype=jnp.float32)[None] * eta2_phi1[:, :, None]
    eta1_phi2, eta2_phi2, pi_phi2 = unpack_recognition_gmm(phi_gmm)
    log_z_given_y_phi, dbg = compute_log_z_given_y(
        eta1_phi1, eta2_phi1, eta1_phi2, eta2_phi2, pi_phi2)
    eta1_phi_tilde = (eta1_phi1[:, None] + eta1_phi2[None])[..., None]   # (N,K,D,1)
    eta2_phi_tilde = eta2_phi1[:, None] + eta2_phi2[None]                # (N,K,D,D)
    phi_tilde = (eta1_phi_tilde, eta2_phi_tilde)
    x_samples = sample_x_per_comp(eta1_phi_tilde, eta2_phi_tilde,
                                  num_latent_sample, key)
    return x_samples, log_z_given_y_phi, phi_tilde, dbg


def svae_forward(params, num_latent_sample, y, key):
    key_eps, key_sub = jax.random.split(key)
    phi_recognition = resmlp_apply(params["recognition"], y, output_type="natparam")
    X_samples, log_z_given_y_phi, phi_tilde, _dbg = e_step(
        phi_recognition, params["phi_gmm"], num_latent_sample, key_eps)
    N, K, S, D = X_samples.shape
    flat = X_samples.reshape(N * K * S, D)
    mean_flat, var_flat = resmlp_apply(params["generative"], flat, output_type="standard")
    input_dim = mean_flat.shape[-1]
    # dec_output_type == 'standard' -> no sigmoid; y_recon = (mean, var)
    y_recon = (mean_flat.reshape(N, K, S, input_dim),
               var_flat.reshape(N, K, S, input_dim))
    X_subsamples = subsample_x(X_samples, log_z_given_y_phi, key_sub)[:, 0, :]
    return (y_recon, phi_recognition, X_samples, X_subsamples,
            log_z_given_y_phi, phi_tilde)


# ----------------------------------------------------------------------------
if __name__ == "__main__":
    key = jax.random.PRNGKey(0)
    input_dim, latent_dim = 16, 8
    enc_hidden = (32, 32)
    dec_hidden = (32, 32)
    num_mixture, num_latent_sample = 6, 4
    N = 4

    k_enc, k_dec, k_mu, k_L, k_pi, k_y, k_run = jax.random.split(key, 7)
    # Deterministic synthetic parameters (init_mm / niw prior machinery only
    # affects theta which is unused by forward(); phi_gmm is what matters).
    params = {
        "recognition": init_resmlp(k_enc, input_dim, enc_hidden, latent_dim),
        "generative": init_resmlp(k_dec, latent_dim, dec_hidden, input_dim),
        "phi_gmm": (
            jax.random.normal(k_mu, (num_mixture, latent_dim), jnp.float32),
            0.1 * jax.random.normal(k_L, (num_mixture, latent_dim, latent_dim),
                                    jnp.float32) + jnp.eye(latent_dim)[None],
            jax.random.normal(k_pi, (num_mixture,), jnp.float32),
        ),
    }
    y = jax.random.normal(k_y, (N, input_dim), jnp.float32)

    outs = svae_forward(params, num_latent_sample, y, k_run)
    outs = jax.block_until_ready(outs)

    y_recon, phi_rec, X_samples, X_sub, log_z, phi_tilde = outs
    assert y_recon[0].shape == (N, num_mixture, num_latent_sample, input_dim)
    assert X_samples.shape == (N, num_mixture, num_latent_sample, latent_dim)
    assert X_sub.shape == (N, latent_dim)
    assert log_z.shape == (N, num_mixture)
    assert bool(jnp.all(jnp.isfinite(log_z)))
    print("KERNEL_OK")
</pallas_src>

<mosaic_0001>
module attributes {stable_mosaic.version = 11 : i64} {
  func.func @_resmlp_fused_kernel(%arg0: i32, %arg1: memref<4x16xf32, #tpu.memory_space<vmem>>, %arg2: memref<16x128xf32, #tpu.memory_space<vmem>>, %arg3: memref<1x128xf32, #tpu.memory_space<vmem>>, %arg4: memref<128x128xf32, #tpu.memory_space<vmem>>, %arg5: memref<1x128xf32, #tpu.memory_space<vmem>>, %arg6: memref<128x128xf32, #tpu.memory_space<vmem>>, %arg7: memref<1x128xf32, #tpu.memory_space<vmem>>, %arg8: memref<128x128xf32, #tpu.memory_space<vmem>>, %arg9: memref<1x128xf32, #tpu.memory_space<vmem>>, %arg10: memref<4x128xf32, #tpu.memory_space<vmem>>, %arg11: memref<4x128xf32, #tpu.memory_space<vmem>>) attributes {dimension_semantics = [#tpu.dimension_semantics<parallel>], iteration_bounds = array<i64: 1>, scalar_prefetch = 0 : i64, scratch_operands = 0 : i64, tpu.core_type = #tpu.core_type<tc>, window_params = [{transform_indices = @transform_0, window_bounds = array<i64: 4, 16>}, {pipeline_mode = #tpu.pipeline_mode<synchronous>, transform_indices = @transform_1, window_bounds = array<i64: 16, 128>}, {pipeline_mode = #tpu.pipeline_mode<synchronous>, transform_indices = @transform_2, window_bounds = array<i64: 1, 128>}, {pipeline_mode = #tpu.pipeline_mode<synchronous>, transform_indices = @transform_3, window_bounds = array<i64: 128, 128>}, {pipeline_mode = #tpu.pipeline_mode<synchronous>, transform_indices = @transform_4, window_bounds = array<i64: 1, 128>}, {pipeline_mode = #tpu.pipeline_mode<synchronous>, transform_indices = @transform_5, window_bounds = array<i64: 128, 128>}, {pipeline_mode = #tpu.pipeline_mode<synchronous>, transform_indices = @transform_6, window_bounds = array<i64: 1, 128>}, {pipeline_mode = #tpu.pipeline_mode<synchronous>, transform_indices = @transform_7, window_bounds = array<i64: 128, 128>}, {pipeline_mode = #tpu.pipeline_mode<synchronous>, transform_indices = @transform_8, window_bounds = array<i64: 1, 128>}, {transform_indices = @transform_9, window_bounds = array<i64: 4, 128>}, {transform_indices = @transform_10, window_bounds = array<i64: 4, 128>}]} {
    %c0 = arith.constant 0 : index
    %c0_0 = arith.constant 0 : index
    %0 = vector.load %arg1[%c0, %c0_0] : memref<4x16xf32, #tpu.memory_space<vmem>>, vector<4x16xf32>
    %c0_1 = arith.constant 0 : index
    %c0_2 = arith.constant 0 : index
    %1 = vector.load %arg2[%c0_1, %c0_2] : memref<16x128xf32, #tpu.memory_space<vmem>>, vector<16x128xf32>
    %c0_3 = arith.constant 0 : index
    %c0_4 = arith.constant 0 : index
    %2 = vector.load %arg3[%c0_3, %c0_4] : memref<1x128xf32, #tpu.memory_space<vmem>>, vector<1x128xf32>
    %3 = arith.truncf %0 : vector<4x16xf32> to vector<4x16xbf16>
    %4 = arith.truncf %1 : vector<16x128xf32> to vector<16x128xbf16>
    %cst = arith.constant dense<0.000000e+00> : vector<4x128xf32>
    %5 = tpu.matmul %3, %4, %cst {dimension_numbers = #tpu.dot_dimension_numbers<[1], [0], [0], [1], [0, 0, 1, 1], [], []>} : vector<4x16xbf16>, vector<16x128xbf16>, vector<4x128xf32> -> vector<4x128xf32>
    %6 = vector.broadcast %2 : vector<1x128xf32> to vector<4x128xf32>
    %7 = arith.addf %5, %6 : vector<4x128xf32>
    %8 = math.tanh %7 : vector<4x128xf32>
    %c0_5 = arith.constant 0 : index
    %c0_6 = arith.constant 0 : index
    %9 = vector.load %arg4[%c0_5, %c0_6] : memref<128x128xf32, #tpu.memory_space<vmem>>, vector<128x128xf32>
    %c0_7 = arith.constant 0 : index
    %c0_8 = arith.constant 0 : index
    %10 = vector.load %arg5[%c0_7, %c0_8] : memref<1x128xf32, #tpu.memory_space<vmem>>, vector<1x128xf32>
    %11 = arith.truncf %8 : vector<4x128xf32> to vector<4x128xbf16>
    %12 = arith.truncf %9 : vector<128x128xf32> to vector<128x128xbf16>
    %cst_9 = arith.constant dense<0.000000e+00> : vector<4x128xf32>
    %13 = tpu.matmul %11, %12, %cst_9 {dimension_numbers = #tpu.dot_dimension_numbers<[1], [0], [0], [1], [0, 0, 1, 1], [], []>} : vector<4x128xbf16>, vector<128x128xbf16>, vector<4x128xf32> -> vector<4x128xf32>
    %14 = vector.broadcast %10 : vector<1x128xf32> to vector<4x128xf32>
    %15 = arith.addf %13, %14 : vector<4x128xf32>
    %16 = math.tanh %15 : vector<4x128xf32>
    %17 = arith.addf %16, %8 : vector<4x128xf32>
    %18 = arith.truncf %17 : vector<4x128xf32> to vector<4x128xbf16>
    %c0_10 = arith.constant 0 : index
    %c0_11 = arith.constant 0 : index
    %19 = vector.load %arg6[%c0_10, %c0_11] : memref<128x128xf32, #tpu.memory_space<vmem>>, vector<128x128xf32>
    %c0_12 = arith.constant 0 : index
    %c0_13 = arith.constant 0 : index
    %20 = vector.load %arg7[%c0_12, %c0_13] : memref<1x128xf32, #tpu.memory_space<vmem>>, vector<1x128xf32>
    %c0_14 = arith.constant 0 : index
    %c0_15 = arith.constant 0 : index
    %21 = vector.load %arg8[%c0_14, %c0_15] : memref<128x128xf32, #tpu.memory_space<vmem>>, vector<128x128xf32>
    %c0_16 = arith.constant 0 : index
    %c0_17 = arith.constant 0 : index
    %22 = vector.load %arg9[%c0_16, %c0_17] : memref<1x128xf32, #tpu.memory_space<vmem>>, vector<1x128xf32>
    %23 = arith.truncf %19 : vector<128x128xf32> to vector<128x128xbf16>
    %cst_18 = arith.constant dense<0.000000e+00> : vector<4x128xf32>
    %24 = tpu.matmul %18, %23, %cst_18 {dimension_numbers = #tpu.dot_dimension_numbers<[1], [0], [0], [1], [0, 0, 1, 1], [], []>} : vector<4x128xbf16>, vector<128x128xbf16>, vector<4x128xf32> -> vector<4x128xf32>
    %25 = vector.broadcast %20 : vector<1x128xf32> to vector<4x128xf32>
    %26 = arith.addf %24, %25 : vector<4x128xf32>
    %27 = arith.truncf %21 : vector<128x128xf32> to vector<128x128xbf16>
    %cst_19 = arith.constant dense<0.000000e+00> : vector<4x128xf32>
    %28 = tpu.matmul %18, %27, %cst_19 {dimension_numbers = #tpu.dot_dimension_numbers<[1], [0], [0], [1], [0, 0, 1, 1], [], []>} : vector<4x128xbf16>, vector<128x128xbf16>, vector<4x128xf32> -> vector<4x128xf32>
    %29 = vector.broadcast %22 : vector<1x128xf32> to vector<4x128xf32>
    %30 = arith.addf %28, %29 : vector<4x128xf32>
    %cst_20 = arith.constant 0.000000e+00 : f32
    %31 = vector.broadcast %cst_20 : f32 to vector<4x128xf32>
    %32 = arith.maximumf %30, %31 : vector<4x128xf32>
    %33 = vector.broadcast %cst_20 : f32 to vector<4x128xf32>
    %34 = arith.subf %30, %33 : vector<4x128xf32>
    %35 = arith.cmpf one, %34, %34 : vector<4x128xf32>
    %36 = vector.broadcast %cst_20 : f32 to vector<4x128xf32>
    %37 = arith.addf %30, %36 : vector<4x128xf32>
    %38 = math.absf %34 : vector<4x128xf32>
    %cst_21 = arith.constant 0.000000e+00 : f32
    %39 = vector.broadcast %cst_21 : f32 to vector<4x128xf32>
    %40 = arith.subf %39, %38 : vector<4x128xf32>
    %41 = math.exp %40 : vector<4x128xf32>
    %42 = math.log1p %41 : vector<4x128xf32>
    %43 = arith.addf %32, %42 : vector<4x128xf32>
    %44 = arith.select %35, %37, %43 : vector<4x128xi1>, vector<4x128xf32>
    %cst_22 = arith.constant -5.000000e-01 : f32
    %45 = vector.broadcast %cst_22 : f32 to vector<4x128xf32>
    %46 = arith.mulf %45, %44 : vector<4x128xf32>
    %c0_23 = arith.constant 0 : index
    %c0_24 = arith.constant 0 : index
    %47 = vector.load %arg10[%c0_23, %c0_24] : memref<4x128xf32, #tpu.memory_space<vmem>>, vector<4x128xf32>
    tpu.vector_store %arg10[%c0_23, %c0_24], %26 {strides = array<i32>} : memref<4x128xf32, #tpu.memory_space<vmem>>, vector<4x128xf32>,
    %c0_25 = arith.constant 0 : index
    %c0_26 = arith.constant 0 : index
    %48 = vector.load %arg11[%c0_25, %c0_26] : memref<4x128xf32, #tpu.memory_space<vmem>>, vector<4x128xf32>
    tpu.vector_store %arg11[%c0_25, %c0_26], %46 {strides = array<i32>} : memref<4x128xf32, #tpu.memory_space<vmem>>, vector<4x128xf32>,
    return
  }
  func.func @transform_0(%arg0: i32) -> (i32, i32) {
    %c0_i32 = arith.constant 0 : i32
    %c0_i32_0 = arith.constant 0 : i32
    return %arg0, %c0_i32 : i32, i32
  }
  func.func @transform_1(%arg0: i32) -> (i32, i32) {
    %c0_i32 = arith.constant 0 : i32
    %c0_i32_0 = arith.constant 0 : i32
    %c0_i32_1 = arith.constant 0 : i32
    return %c0_i32, %c0_i32_0 : i32, i32
  }
  func.func @transform_2(%arg0: i32) -> (i32, i32) {
    %c0_i32 = arith.constant 0 : i32
    %c0_i32_0 = arith.constant 0 : i32
    %c0_i32_1 = arith.constant 0 : i32
    return %c0_i32, %c0_i32_0 : i32, i32
  }
  func.func @transform_3(%arg0: i32) -> (i32, i32) {
    %c0_i32 = arith.constant 0 : i32
    %c0_i32_0 = arith.constant 0 : i32
    %c0_i32_1 = arith.constant 0 : i32
    return %c0_i32, %c0_i32_0 : i32, i32
  }
  func.func @transform_4(%arg0: i32) -> (i32, i32) {
    %c0_i32 = arith.constant 0 : i32
    %c0_i32_0 = arith.constant 0 : i32
    %c0_i32_1 = arith.constant 0 : i32
    return %c0_i32, %c0_i32_0 : i32, i32
  }
  func.func @transform_5(%arg0: i32) -> (i32, i32) {
    %c0_i32 = arith.constant 0 : i32
    %c0_i32_0 = arith.constant 0 : i32
    %c0_i32_1 = arith.constant 0 : i32
    return %c0_i32, %c0_i32_0 : i32, i32
  }
  func.func @transform_6(%arg0: i32) -> (i32, i32) {
    %c0_i32 = arith.constant 0 : i32
    %c0_i32_0 = arith.constant 0 : i32
    %c0_i32_1 = arith.constant 0 : i32
    return %c0_i32, %c0_i32_0 : i32, i32
  }
  func.func @transform_7(%arg0: i32) -> (i32, i32) {
    %c0_i32 = arith.constant 0 : i32
    %c0_i32_0 = arith.constant 0 : i32
    %c0_i32_1 = arith.constant 0 : i32
    return %c0_i32, %c0_i32_0 : i32, i32
  }
  func.func @transform_8(%arg0: i32) -> (i32, i32) {
    %c0_i32 = arith.constant 0 : i32
    %c0_i32_0 = arith.constant 0 : i32
    %c0_i32_1 = arith.constant 0 : i32
    return %c0_i32, %c0_i32_0 : i32, i32
  }
  func.func @transform_9(%arg0: i32) -> (i32, i32) {
    %c0_i32 = arith.constant 0 : i32
    %c0_i32_0 = arith.constant 0 : i32
    return %arg0, %c0_i32 : i32, i32
  }
  func.func @transform_10(%arg0: i32) -> (i32, i32) {
    %c0_i32 = arith.constant 0 : i32
    %c0_i32_0 = arith.constant 0 : i32
    return %arg0, %c0_i32 : i32, i32
  }
}

</mosaic_0001>

<bundles_post_ra>
// kernel: tpu_custom_call.1
= control target key start
LH: loop header
LB: loop body
LE: loop exit
PB: predicated region body
PF: predicated region fallthrough
CT: control target
= control target key end

     0   :  { %16 = vsyncpa [#allocation3], 0  ;;  %s847_s0 = inlined_call_operand.hbm [shape: f32[4,16], index: 0, kind: input, shape index: {}]   ;;  %s848_s1 = inlined_call_operand.hbm [shape: f32[16,128], index: 1, kind: input, shape index: {}]   ;;  %s849_s2 = inlined_call_operand.vmem [shape: f32[1,128], index: 2, kind: input, shape index: {}]   ;;  %s850_s3 = inlined_call_operand.hbm [shape: f32[128,128], index: 3, kind: input, shape index: {}]   ;;  %s851_s4 = inlined_call_operand.vmem [shape: f32[1,128], index: 4, kind: input, shape index: {}]   ;;  %s852_s5 = inlined_call_operand.hbm [shape: f32[128,128], index: 5, kind: input, shape index: {}]   ;;  %s853_s6 = inlined_call_operand.vmem [shape: f32[1,128], index: 6, kind: input, shape index: {}]   ;;  %s854_s7 = inlined_call_operand.hbm [shape: f32[128,128], index: 7, kind: input, shape index: {}]   ;;  %s855_s8 = inlined_call_operand.vmem [shape: f32[1,128], index: 8, kind: input, shape index: {}]   ;;  %s856_s9 = inlined_call_operand.hbm [shape: f32[4,128], index: 9, kind: output, shape index: {0}]   ;;  %s857_s10 = inlined_call_operand.hbm [shape: f32[4,128], index: 10, kind: output, shape index: {1}]  }
   0x1   :  { %17 = vsyncpa [#allocation6], 0 }
   0x2   :  { %18 = vsyncpa [#allocation9], 0 }
   0x3   :  { %19 = vsyncpa [#allocation4], 0 }
   0x4   :  { %20 = vsyncpa [#allocation13], 0  ;;  %s698_s13 = smov [#allocation5]  }
   0x5   :  { %s36_s14 = sshll.u32 %s698_s13, 4  ;;  %s37_s14 = int_to_ptr.vmem [resolvable:$true] %s36_s14 }
   0x6   :  { %s556_s15 = scalar_lea.vmem %s37_s14, 256  ;;  %p561_p1 = scmp.lt.s32.totalorder %s37_s14, %s37_s14 }
   0x7   :  { %p557_p0 = scmp.ne.s32.totalorder %s37_s14, %s556_s15  ;;  %p562_p2 = scmp.lt.s32.totalorder %s556_s15, %s556_s15 }
   0x9   :  { %p563_p3 = por %p562_p2, %p561_p1 }
   0xb   :  { %p564_p4 = pnand %p563_p3, %p557_p0 }
   0xd   :  { %567 = shalt.err (!%p564_p4)
}
   0xe   :  { %s699_s16 = smov 128   ;;  %s700_s17 = smov 8  }
   0xf   :  { %42 = dma.hbm_to_vmem [thread:$0]  %s848_s1, 256, %s37_s14, [#allocation6], %s699_s16, %s699_s16, %s700_s17  }
  0x10   :  { %s701_s20 = smov [#allocation8]   ;;  %s702_s22 = smov [#allocation2]  }
  0x11   :  { %s64_s21 = sshll.u32 %s701_s20, 4  ;;  %s27_s23 = sshll.u32 %s702_s22, 4  ;;  %s65_s21 = int_to_ptr.vmem [resolvable:$true] %s64_s21  ;;  %s28_s23 = int_to_ptr.vmem [resolvable:$true] %s27_s23 }
  0x12   :  { %s576_s24 = scalar_lea.vmem %s65_s21, 2048  ;;  %p581_p6 = scmp.lt.s32.totalorder %s65_s21, %s65_s21 }
  0x13   :  { %p577_p5 = scmp.ne.s32.totalorder %s65_s21, %s576_s24  ;;  %p582_p7 = scmp.lt.s32.totalorder %s576_s24, %s576_s24 }
  0x15   :  { %p583_p8 = por %p582_p7, %p581_p6 }
  0x17   :  { %p584_p9 = pnand %p583_p8, %p577_p5 }
  0x19   :  { %587 = shalt.err (!%p584_p9)
}
  0x1a   :  { %70 = dma.hbm_to_vmem [thread:$0]  %s852_s5, 2048, %s65_s21, [#allocation9], %s699_s16, %s699_s16, %s700_s17  }
  0x1b   :  { %s596_s1 = scalar_lea.vmem %s28_s23, 64  ;;  %p601_p11 = scmp.lt.s32.totalorder %s28_s23, %s28_s23 }
  0x1c   :  { %p597_p10 = scmp.ne.s32.totalorder %s28_s23, %s596_s1  ;;  %p602_p12 = scmp.lt.s32.totalorder %s596_s1, %s596_s1 }
  0x1e   :  { %p603_p13 = por %p602_p12, %p601_p11 }
  0x20   :  { %p604_p0 = pnand %p603_p13, %p597_p10 }
  0x22   :  { %607 = shalt.err (!%p604_p0)
}
  0x23   :  { %30 = dma.hbm_to_vmem [thread:$0]  %s847_s0, 64, %s28_s23, [#allocation3]  }
  0x24   :  { %s703_s29 = smov [#allocation7]   ;;  %s704_s11 = smov [#allocation10]  }
  0x25   :  { %s50_s30 = sshll.u32 %s703_s29, 4  ;;  %s78_s12 = sshll.u32 %s704_s11, 4  ;;  %s51_s30 = int_to_ptr.vmem [resolvable:$true] %s50_s30  ;;  %s79_s12 = int_to_ptr.vmem [resolvable:$true] %s78_s12 }
  0x26   :  { %s616_s13 = scalar_lea.vmem %s51_s30, 2048  ;;  %p621_p2 = scmp.lt.s32.totalorder %s51_s30, %s51_s30 }
  0x27   :  { %p617_p1 = scmp.ne.s32.totalorder %s51_s30, %s616_s13  ;;  %p622_p3 = scmp.lt.s32.totalorder %s616_s13, %s616_s13 }
  0x29   :  { %p623_p4 = por %p622_p3, %p621_p2 }
  0x2b   :  { %p624_p5 = pnand %p623_p4, %p617_p1 }
  0x2d   :  { %627 = shalt.err (!%p624_p5)
}
  0x2e   :  { %56 = dma.hbm_to_vmem [thread:$0]  %s850_s3, 2048, %s51_s30, [#allocation6], %s699_s16, %s699_s16, %s700_s17  }
  0x2f   :  { %s636_s0 = scalar_lea.vmem %s79_s12, 2048  ;;  %p641_p7 = scmp.lt.s32.totalorder %s79_s12, %s79_s12 }
  0x30   :  { %p637_p6 = scmp.ne.s32.totalorder %s79_s12, %s636_s0  ;;  %p642_p8 = scmp.lt.s32.totalorder %s636_s0, %s636_s0 }
  0x32   :  { %p643_p9 = por %p642_p8, %p641_p7 }
  0x34   :  { %p644_p10 = pnand %p643_p9, %p637_p6 }
  0x36   :  { %647 = shalt.err (!%p644_p10)
}
  0x37   :  { %84 = dma.hbm_to_vmem [thread:$0]  %s854_s7, 2048, %s79_s12, [#allocation9], %s699_s16, %s699_s16, %s700_s17  }
  0x38   :  { %688 = dma.done.wait [#allocation3], 64  }
  0x39   :  { %689 = vsyncadd [#allocation3], 4294967232 }
  0x3a   :  { %690 = dma.done.wait [#allocation6], 2304  }
  0x3b   :  { %691 = vsyncadd [#allocation6], 4294964992 }
  0x3c   :  { %692 = dma.done.wait [#allocation9], 4096  }
  0x3d   :  { %693 = vsyncadd [#allocation9], 4294963200  ;;  %v705_v0 = vmov 0.0   ;;  %vm706_vm0 = vmmov 0   ;;  %v104_v1 = vld [vmem:[#allocation5] sm:$0xff]  ;;  %v105_v2 = vld [vmem:[#allocation5 + $0x8] sm:$0xff] }
  0x3e   :  { %463 = vmatprep.subr.bf16.mxu0 %v705_v0  ;;  %465 = vmatprep.mubr.msk.bf16.mxu0 %vm706_vm0, %v705_v0  ;;  %v103_v3 = vld [vmem:[#allocation2] sm:$0xf]  ;;  %v108_v4 = vpack.c.bf16 %v105_v2, %v104_v1  ;;  %v174_v5 = vld [vmem:[#allocation7 + $0x70] sm:$0xff]  ;;  %v175_v6 = vld [vmem:[#allocation7 + $0x78] sm:$0xff]  ;;  %vm115_vm1 = vcmask 130048  }
  0x3f   :  { %469 = vmatprep.subr.bf16.mxu1 %v705_v0  ;;  %485 = vmatprep.mubr.msk.bf16.mxu1 %vm706_vm0, %v705_v0  ;;  %v172_v7 = vld [vmem:[#allocation7 + $0x60] sm:$0xff]  ;;  %v107_v8 = vpack.c.bf16 %v103_v3, %v103_v3  ;;  %v185_v9 = vpack.c.bf16 %v175_v6, %v174_v5  ;;  %v173_v10 = vld [vmem:[#allocation7 + $0x68] sm:$0xff]  ;;  %v170_v12 = vld [vmem:[#allocation7 + $0x50] sm:$0xff] }
  0x40   :  { %464 = vmatpush3.bf16.msra.mxu0 %v108_v4  ;;  %v184_v11 = vpack.c.bf16 %v173_v10, %v172_v7  ;;  %v171_v13 = vld [vmem:[#allocation7 + $0x58] sm:$0xff]  ;;  %v168_v15 = vld [vmem:[#allocation7 + $0x40] sm:$0xff]  ;;  %v169_v16 = vld [vmem:[#allocation7 + $0x48] sm:$0xff] }
  0x41   :  { %470 = vmatpush3.bf16.msra.mxu1 %v185_v9  ;;  %489 = vmatprep.subr.bf16.mxu0 %v705_v0  ;;  %v183_v14 = vpack.c.bf16 %v171_v13, %v170_v12  ;;  %v182_v17 = vpack.c.bf16 %v169_v16, %v168_v15  ;;  %v166_v18 = vld [vmem:[#allocation7 + $0x30] sm:$0xff]  ;;  %v167_v19 = vld [vmem:[#allocation7 + $0x38] sm:$0xff]  ;;  %v164_v21 = vld [vmem:[#allocation7 + $0x20] sm:$0xff] }
  0x42   :  { %471 = vmatprep.subr.bf16.mxu1 %v705_v0  ;;  %v181_v20 = vpack.c.bf16 %v167_v19, %v166_v18  ;;  %v165_v22 = vld [vmem:[#allocation7 + $0x28] sm:$0xff]  ;;  %v162_v24 = vld [vmem:[#allocation7 + $0x10] sm:$0xff]  ;;  %v163_v25 = vld [vmem:[#allocation7 + $0x18] sm:$0xff] }
  0x43   :  { %466 = vmatmul.mubr.msk.bf16.vlgmr.msra.gmra.mxu0 %vm115_vm1, %v107_v8  ;;  %v180_v23 = vpack.c.bf16 %v165_v22, %v164_v21  ;;  %v179_v26 = vpack.c.bf16 %v163_v25, %v162_v24  ;;  %v160_v27 = vld [vmem:[#allocation7] sm:$0xff]  ;;  %v161_v28 = vld [vmem:[#allocation7 + $0x8] sm:$0xff]  ;;  %v249_v30 = vld [vmem:[#allocation8 + $0x70] sm:$0xff] }
  0x44   :  { %505 = vmatprep.mubr.msk.bf16.mxu0 %vm706_vm0, %v705_v0  ;;  %v178_v29 = vpack.c.bf16 %v161_v28, %v160_v27  ;;  %v250_v31 = vld [vmem:[#allocation8 + $0x78] sm:$0xff]  ;;  %v247_v33 = vld [vmem:[#allocation8 + $0x60] sm:$0xff]  ;;  %v248_v34 = vld [vmem:[#allocation8 + $0x68] sm:$0xff] }
  0x45   :  { %472 = vmatpush3.bf16.msra.mxu1 %v184_v11  ;;  %v276_v32 = vpack.c.bf16 %v250_v31, %v249_v30  ;;  %v275_v35 = vpack.c.bf16 %v248_v34, %v247_v33  ;;  %v245_v36 = vld [vmem:[#allocation8 + $0x50] sm:$0xff]  ;;  %v246_v37 = vld [vmem:[#allocation8 + $0x58] sm:$0xff]  ;;  %v429_v39 = vld [vmem:[%s849_s2] ss:$0 sm:$0xff] }
  0x46   :  { %473 = vmatprep.subr.bf16.mxu1 %v705_v0  ;;  %v274_v38 = vpack.c.bf16 %v246_v37, %v245_v36  ;;  %v266_v45 = vld [vmem:[#allocation10 + $0x70] sm:$0xff]  ;;  %v267_v46 = vld [vmem:[#allocation10 + $0x78] sm:$0xff]  ;;  %v264_v50 = vld [vmem:[#allocation10 + $0x60] sm:$0xff] }
  0x47   :  { %490 = vmatpush3.bf16.msra.mxu0 %v276_v32  ;;  %v330_v48 = vpack.c.bf16 %v267_v46, %v266_v45  ;;  %v265_v51 = vld [vmem:[#allocation10 + $0x68] sm:$0xff]  ;;  %v262_v53 = vld [vmem:[#allocation10 + $0x50] sm:$0xff]  ;;  %v263_v54 = vld [vmem:[#allocation10 + $0x58] sm:$0xff] }
  0x48   :  { %491 = vmatprep.subr.bf16.mxu0 %v705_v0  ;;  %v329_v52 = vpack.c.bf16 %v265_v51, %v264_v50  ;;  %v328_v55 = vpack.c.bf16 %v263_v54, %v262_v53  ;;  %v243_v56 = vld [vmem:[#allocation8 + $0x40] sm:$0xff]  ;;  %v244_v57 = vld [vmem:[#allocation8 + $0x48] sm:$0xff]  ;;  %v241_v62 = vld [vmem:[#allocation8 + $0x30] sm:$0xff] }
  0x49   :  { %474 = vmatpush3.bf16.msra.mxu1 %v183_v14  ;;  %v260_v58 = vld [vmem:[#allocation10 + $0x40] sm:$0xff]  ;;  %v273_v59 = vpack.c.bf16 %v244_v57, %v243_v56  ;;  %v261_v60 = vld [vmem:[#allocation10 + $0x48] sm:$0xff]  ;;  %v242_v63 = vld [vmem:[#allocation8 + $0x38] sm:$0xff] }
  0x4a   :  { %475 = vmatprep.subr.bf16.mxu1 %v705_v0  ;;  %v327_v61 = vpack.c.bf16 %v261_v60, %v260_v58  ;;  %v258_v1 = vld [vmem:[#allocation10 + $0x30] sm:$0xff]  ;;  %v272_v2 = vpack.c.bf16 %v242_v63, %v241_v62  ;;  %v259_v3 = vld [vmem:[#allocation10 + $0x38] sm:$0xff]  ;;  %v239_v5 = vld [vmem:[#allocation8 + $0x20] sm:$0xff] }
  0x4b   :  { %492 = vmatpush3.bf16.msra.mxu0 %v275_v35  ;;  %v326_v4 = vpack.c.bf16 %v259_v3, %v258_v1  ;;  %v240_v6 = vld [vmem:[#allocation8 + $0x28] sm:$0xff]  ;;  %v256_v7 = vld [vmem:[#allocation10 + $0x20] sm:$0xff]  ;;  %v237_v10 = vld [vmem:[#allocation8 + $0x10] sm:$0xff] }
  0x4c   :  { %493 = vmatprep.subr.bf16.mxu0 %v705_v0  ;;  %v271_v8 = vpack.c.bf16 %v240_v6, %v239_v5  ;;  %v257_v9 = vld [vmem:[#allocation10 + $0x28] sm:$0xff]  ;;  %v238_v11 = vld [vmem:[#allocation8 + $0x18] sm:$0xff]  ;;  %v254_v13 = vld [vmem:[#allocation10 + $0x10] sm:$0xff] }
  0x4d   :  { %476 = vmatpush3.bf16.msra.mxu1 %v182_v17  ;;  %v325_v12 = vpack.c.bf16 %v257_v9, %v256_v7  ;;  %v255_v14 = vld [vmem:[#allocation10 + $0x18] sm:$0xff]  ;;  %v270_v15 = vpack.c.bf16 %v238_v11, %v237_v10  ;;  %v235_v17 = vld [vmem:[#allocation8] sm:$0xff]  ;;  %v236_v18 = vld [vmem:[#allocation8 + $0x8] sm:$0xff] }
  0x4e   :  { %477 = vmatprep.subr.bf16.mxu1 %v705_v0  ;;  %v324_v16 = vpack.c.bf16 %v255_v14, %v254_v13  ;;  %v252_v19 = vld [vmem:[#allocation10] sm:$0xff]  ;;  %v269_v21 = vpack.c.bf16 %v236_v18, %v235_v17  ;;  %v433_v32 = vld [vmem:[%s855_s8] ss:$0 sm:$0xff] }
  0x4f   :  { %494 = vmatpush3.bf16.msra.mxu0 %v274_v38 }
  0x50   :  { %495 = vmatprep.subr.bf16.mxu0 %v705_v0 }
  0x51   :  { %478 = vmatpush3.bf16.msra.mxu1 %v181_v20  ;;  %v253_v20 = vld [vmem:[#allocation10 + $0x8] sm:$0xff] }
  0x52   :  { %479 = vmatprep.subr.bf16.mxu1 %v705_v0  ;;  %v323_v22 = vpack.c.bf16 %v253_v20, %v252_v19 }
  0x53   :  { %496 = vmatpush3.bf16.msra.mxu0 %v273_v59 }
  0x54   :  { %497 = vmatprep.subr.bf16.mxu0 %v705_v0 }
  0x55   :  { %480 = vmatpush3.bf16.msra.mxu1 %v180_v23  ;;  %v431_v23 = vld [vmem:[%s851_s4] ss:$0 sm:$0xff]  ;;  %s707_s4 = smov [#allocation11]  }
  0x56   :  { %481 = vmatprep.subr.bf16.mxu1 %v705_v0  ;;  %s404_s22 = sshll.u32 %s707_s4, 4  ;;  %s405_s22 = int_to_ptr.vmem [resolvable:$true] %s404_s22 }
  0x57   :  { %498 = vmatpush3.bf16.msra.mxu0 %v272_v2  ;;  %s648_s23 = scalar_lea.vmem %s405_s22, 64  ;;  %p653_p12 = scmp.lt.s32.totalorder %s405_s22, %s405_s22 }
  0x58   :  { %499 = vmatprep.subr.bf16.mxu0 %v705_v0  ;;  %p649_p11 = scmp.ne.s32.totalorder %s405_s22, %s648_s23  ;;  %p654_p13 = scmp.lt.s32.totalorder %s648_s23, %s648_s23 }
  0x59   :  { %482 = vmatpush3.bf16.msra.mxu1 %v179_v26 }
  0x5a   :  { %483 = vmatprep.subr.bf16.mxu1 %v705_v0  ;;  %p655_p0 = por %p654_p13, %p653_p12 }
  0x5b   :  { %500 = vmatpush3.bf16.msra.mxu0 %v271_v8 }
  0x5c   :  { %501 = vmatprep.subr.bf16.mxu0 %v705_v0  ;;  %p656_p1 = pnand %p655_p0, %p649_p11 }
  0x5d   :  { %484 = vmatpush3.bf16.msra.mxu1 %v178_v29 }
  0x5e   :  { %509 = vmatprep.subr.bf16.mxu1 %v705_v0 }
  0x5f   :  { %502 = vmatpush3.bf16.msra.mxu0 %v270_v15 }
  0x60   :  { %503 = vmatprep.subr.bf16.mxu0 %v705_v0 }
  0x63   :  { %504 = vmatpush3.bf16.msra.mxu0 %v269_v21 }
 0x103   :  { %v153_v40 = vpop.f32.mrf.mxu0 }
 0x104   :  { %v154_v41 = vadd.f32 %v429_v39, %v153_v40 }
 0x105   :  { %v467_v42 = vpop.f32.mrf.mxu0 }
 0x106   :  { %540 = vtanh.f32 %v154_v41 }
 0x107   :  { %v156_v43 = vpop.f32.mrf.mxu0 }
 0x109   :  { %v468_v44 = vpop.f32.mrf.mxu0 }
 0x113   :  { %v814_v47 = vpop.eup %540 }
 0x114   :  { %v177_v49 = vpack.c.bf16 %v814_v47, %v814_v47 }
 0x116   :  { %486 = vmatmul.mubr.bf16.vlgmr.msra.gmra.mxu1 %v177_v49 }
 0x117   :  { %510 = vmatpush3.bf16.msra.mxu1 %v330_v48  ;;  %525 = vmatprep.mubr.msk.bf16.mxu1 %vm706_vm0, %v705_v0 }
 0x118   :  { %511 = vmatprep.subr.bf16.mxu1 %v705_v0 }
 0x11b   :  { %512 = vmatpush3.bf16.msra.mxu1 %v329_v52 }
 0x11c   :  { %513 = vmatprep.subr.bf16.mxu1 %v705_v0 }
 0x11f   :  { %514 = vmatpush3.bf16.msra.mxu1 %v328_v55 }
 0x120   :  { %515 = vmatprep.subr.bf16.mxu1 %v705_v0 }
 0x123   :  { %516 = vmatpush3.bf16.msra.mxu1 %v327_v61 }
 0x124   :  { %517 = vmatprep.subr.bf16.mxu1 %v705_v0 }
 0x127   :  { %518 = vmatpush3.bf16.msra.mxu1 %v326_v4 }
 0x128   :  { %519 = vmatprep.subr.bf16.mxu1 %v705_v0 }
 0x12b   :  { %520 = vmatpush3.bf16.msra.mxu1 %v325_v12 }
 0x12c   :  { %521 = vmatprep.subr.bf16.mxu1 %v705_v0 }
 0x12f   :  { %522 = vmatpush3.bf16.msra.mxu1 %v324_v16 }
 0x130   :  { %523 = vmatprep.subr.bf16.mxu1 %v705_v0  ;;  %v432_v0 = vld [vmem:[%s853_s6] ss:$0 sm:$0xff] }
 0x133   :  { %524 = vmatpush3.bf16.msra.mxu1 %v323_v22 }
 0x1d6   :  { %v226_v24 = vpop.f32.mrf.mxu1 }
 0x1d7   :  { %v227_v25 = vadd.f32 %v431_v23, %v226_v24 }
 0x1d8   :  { %v487_v26 = vpop.f32.mrf.mxu1 }
 0x1d9   :  { %542 = vtanh.f32 %v227_v25 }
 0x1da   :  { %v229_v27 = vpop.f32.mrf.mxu1 }
 0x1dc   :  { %v488_v28 = vpop.f32.mrf.mxu1 }
 0x1e6   :  { %v543_v29 = vpop.eup %542 }
 0x1e7   :  { %v233_v30 = vadd.f32 %v543_v29, %v814_v47 }
 0x1e9   :  { %v234_v31 = vpack.c.bf16 %v233_v30, %v233_v30 }
 0x1eb   :  { %506 = vmatmul.mubr.bf16.vlgmr.msra.gmra.mxu0 %v234_v31  ;;  %526 = vmatmul.mubr.bf16.vlgmr.msra.gmra.mxu1 %v234_v31 }
 0x2ab   :  { %v317_v33 = vpop.f32.mrf.mxu0  ;;  %v371_v34 = vpop.f32.mrf.mxu1 }
 0x2ac   :  { %v318_v35 = vadd.f32 %v432_v0, %v317_v33  ;;  %v372_v36 = vadd.f32 %v433_v32, %v371_v34 }
 0x2ad   :  { %v507_v37 = vpop.f32.mrf.mxu0  ;;  %v527_v38 = vpop.f32.mrf.mxu1 }
 0x2ae   :  { %396 = vst [vmem:[#allocation11] sm:$0xf] %v318_v35  ;;  %v380_v39 = vand.u32 2147483647, %v372_v36 }
 0x2af   :  { %v320_v40 = vpop.f32.mrf.mxu0  ;;  %v374_v41 = vpop.f32.mrf.mxu1 }
 0x2b0   :  { %659 = shalt.err (!%p656_p1)
}
 0x2b1   :  { %407 = dma.vmem_to_hbm [thread:$0]  %s405_s22, 64, %s856_s9, [#allocation4]   ;;  %v381_v42 = vsub.f32 0.0, %v380_v39  ;;  %v508_v43 = vpop.f32.mrf.mxu0  ;;  %v528_v44 = vpop.f32.mrf.mxu1  ;;  %v377_v54 = vmax.f32 %v372_v36, 0.0  ;;  %vm378_vm3 = vcmp.ne.f32.partialorder %v372_v36, %v372_v36 }
 0x2b2   :  { %s708_s24 = smov [#allocation12]  }
 0x2b3   :  { %v382_v45 = vmul.f32 1.442695, %v381_v42  ;;  %s414_s9 = sshll.u32 %s708_s24, 4  ;;  %s415_s9 = int_to_ptr.vmem [resolvable:$true] %s414_s9 }
 0x2b4   :  { %s668_s25 = scalar_lea.vmem %s415_s9, 64  ;;  %p673_p3 = scmp.lt.s32.totalorder %s415_s9, %s415_s9 }
 0x2b5   :  { %544 = vpow2.f32 %v382_v45  ;;  %p669_p2 = scmp.ne.s32.totalorder %s415_s9, %s668_s25  ;;  %p674_p4 = scmp.lt.s32.totalorder %s668_s25, %s668_s25 }
 0x2b7   :  { %p675_p5 = por %p674_p4, %p673_p3 }
 0x2b9   :  { %p676_p6 = pnand %p675_p5, %p669_p2 }
 0x2c2   :  { %v545_v46 = vpop.eup %544 }
 0x2c3   :  { %v384_v47 = vadd.f32 1.0, %v545_v46  ;;  %v387_v48 = vmul.f32 -0.5, %v545_v46  ;;  %v390_v50 = vand.u32 2147483647, %v545_v46 }
 0x2c5   :  { %546 = vlog2.f32 %v384_v47  ;;  %v388_v49 = vadd.f32 1.0, %v387_v48  ;;  %vm391_vm2 = vcmp.lt.f32.partialorder %v390_v50, 0.0004427343 }
 0x2c7   :  { %v389_v53 = vmul.f32 %v545_v46, %v388_v49 }
 0x2d2   :  { %v547_v51 = vpop.eup %546 }
 0x2d3   :  { %v386_v52 = vmul.f32 0.6931472, %v547_v51 }
 0x2d5   :  { %v392_v55 = vsel %vm391_vm2, %v389_v53, %v386_v52 }
 0x2d6   :  { %v393_v56 = vadd.f32 %v392_v55, %v377_v54 }
 0x2d8   :  { %v394_v57 = vsel %vm378_vm3, %v372_v36, %v393_v56 }
 0x2d9   :  { %v395_v58 = vmul.f32 -0.5, %v394_v57 }
 0x2db   :  { %397 = vst [vmem:[#allocation12] sm:$0xf] %v395_v58 }
 0x2dc   :  { %679 = shalt.err (!%p676_p6)
}
 0x2dd   :  { %417 = dma.vmem_to_hbm [thread:$0]  %s415_s9, 64, %s857_s10, [#allocation13]  }
 0x2de   :  { %694 = dma.done.wait [#allocation4], 64  }
 0x2df   :  { %695 = vsyncadd [#allocation4], 4294967232 }
 0x2e0   :  { %696 = dma.done.wait [#allocation13], 64  }
 0x2e1   :  { %697 = vsyncadd [#allocation13], 4294967232 }
 0x2e2   :  { %424 = vsyncpa [#allocation3], 1 }
 0x2e3   :  { %425 = vsyncpa [#allocation6], 1 }
 0x2e4   :  { %426 = vsyncpa [#allocation9], 1 }
 0x2e5   :  { %427 = vsyncpa [#allocation4], 1 }
 0x2e6   :  { %428 = vsyncpa [#allocation13], 1 }

</bundles_post_ra>
